<compile_context>
chip_gen: v7x
topology: tpu7x:2x2x1
jax: 0.10.0
libtpu: 0.0.40
codegen_flags: <defaults>
</compile_context>

<pallas_src>
import functools

import jax
import jax.numpy as jnp
import numpy as np
from jax.experimental import pallas as pl
from jax.experimental.pallas import tpu as pltpu


def _round_up(x: int, m: int) -> int:
    return ((x + m - 1) // m) * m


def _pick_tile(size: int, prefs) -> int:
    for t in prefs:
        if size % t == 0:
            return t
    return 128


_COMPILER_PARAMS = pltpu.CompilerParams(
    dimension_semantics=("parallel", "parallel", "arbitrary"),
    vmem_limit_bytes=32 * 1024 * 1024,  # scoped-safe on v5e / v6e / v7x
)


# --------------------------------------------------------------------------
# Kernel 1:  h = bf16( d[:, None] * (x @ W) )      (x, W bf16, f32 accumulate)
# --------------------------------------------------------------------------
def _feat_kernel(x_ref, w_ref, d_ref, h_ref, acc_ref):
    k = pl.program_id(2)

    @pl.when(k == 0)
    def _():
        acc_ref[...] = jnp.zeros_like(acc_ref)

    acc_ref[...] += jnp.dot(
        x_ref[...], w_ref[...], preferred_element_type=jnp.float32
    )

    @pl.when(k == pl.num_programs(2) - 1)
    def _():
        h_ref[...] = (d_ref[...] * acc_ref[...]).astype(h_ref.dtype)


def _feat_transform(x, w, d, *, tm, tn, tk):
    n, cin = x.shape
    cout = w.shape[1]
    grid = (n // tm, cout // tn, cin // tk)
    return pl.pallas_call(
        _feat_kernel,
        out_shape=jax.ShapeDtypeStruct((n, cout), jnp.bfloat16),
        grid_spec=pltpu.PrefetchScalarGridSpec(
            num_scalar_prefetch=0,
            grid=grid,
            in_specs=[
                pl.BlockSpec((tm, tk), lambda i, j, k: (i, k)),
                pl.BlockSpec((tk, tn), lambda i, j, k: (k, j)),
                pl.BlockSpec((tm, 1), lambda i, j, k: (i, 0)),
            ],
            out_specs=pl.BlockSpec((tm, tn), lambda i, j, k: (i, j)),
            scratch_shapes=[pltpu.VMEM((tm, tn), jnp.float32)],
        ),
        compiler_params=_COMPILER_PARAMS,
    )(x, w, d)


# --------------------------------------------------------------------------
# Kernel 2:  out = ReLU( d[:, None] * (adj_t @ h) )       (adj_t, h in bf16)
# The f32 output block is the accumulator (resident across the K grid axis).
# --------------------------------------------------------------------------
def _agg_kernel_tiled_h(adj_ref, h_ref, d_ref, o_ref):
    k = pl.program_id(2)

    @pl.when(k == 0)
    def _():
        o_ref[...] = jnp.zeros_like(o_ref)

    o_ref[...] += jnp.dot(
        adj_ref[...], h_ref[...], preferred_element_type=jnp.float32
    )

    @pl.when(k == pl.num_programs(2) - 1)
    def _():
        o_ref[...] = jnp.maximum(d_ref[...] * o_ref[...], 0.0)


def _agg_kernel_resident_h(adj_ref, h_ref, d_ref, o_ref, *, tk):
    k = pl.program_id(2)

    @pl.when(k == 0)
    def _():
        o_ref[...] = jnp.zeros_like(o_ref)

    koff = pl.multiple_of(k * tk, tk)
    o_ref[...] += jnp.dot(
        adj_ref[...], h_ref[pl.ds(koff, tk), :],
        preferred_element_type=jnp.float32,
    )

    @pl.when(k == pl.num_programs(2) - 1)
    def _():
        o_ref[...] = jnp.maximum(d_ref[...] * o_ref[...], 0.0)


def _aggregate(adj_t, h, d, *, tm, tn, tk, resident_h):
    n = adj_t.shape[0]
    cout = h.shape[1]
    grid = (n // tm, cout // tn, n // tk)
    if resident_h:
        # Whole h resident in VMEM: DMA'd once, not once per (i, k).
        kernel = functools.partial(_agg_kernel_resident_h, tk=tk)
        h_spec = pl.BlockSpec((n, tn), lambda i, j, k: (0, j))
    else:
        kernel = _agg_kernel_tiled_h
        h_spec = pl.BlockSpec((tk, tn), lambda i, j, k: (k, j))
    return pl.pallas_call(
        kernel,
        out_shape=jax.ShapeDtypeStruct((n, cout), jnp.float32),
        grid_spec=pltpu.PrefetchScalarGridSpec(
            num_scalar_prefetch=0,
            grid=grid,
            in_specs=[
                pl.BlockSpec((tm, tk), lambda i, j, k: (i, k)),
                h_spec,
                pl.BlockSpec((tm, 1), lambda i, j, k: (i, 0)),
            ],
            out_specs=pl.BlockSpec((tm, tn), lambda i, j, k: (i, j)),
        ),
        compiler_params=_COMPILER_PARAMS,
    )(adj_t, h, d)


def _agg_tiles(np_: int, cout_p: int, resident_h: bool):
    tm = min(512, np_)
    tn = cout_p  # full Cout -> j-grid extent 1 -> adjacency streamed once
    tk = _pick_tile(np_, (2048, 1024, 512, 256, 128))
    # Keep the double-buffered per-step working set well inside scoped VMEM.
    budget = 24 * 1024 * 1024

    def _bytes(tk_):
        adj = 2 * tm * tk_ * 2                              # bf16, 2 buffers
        hb = (2 * np_ * cout_p * 2) if resident_h else (2 * tk_ * tn * 2)
        out = 2 * tm * tn * 4                               # f32, 2 buffers
        return adj + hb + out

    while tk > 128 and _bytes(tk) > budget:
        tk //= 2
    return tm, tn, tk


# --------------------------------------------------------------------------
# Wrapper: ShareGCN.forward (share=True path), eval mode.
# --------------------------------------------------------------------------
def share_gcn_forward(x, w, u_edge_index, u_edge_weight, v_edge_index,
                      v_edge_weight, num_nodes):
    N = int(num_nodes)
    Cin = x.shape[1]
    Cout = w.shape[1]

    # Combined COO edge list (duplicate edges sum, like sparse_coo coalesce).
    row = jnp.concatenate([u_edge_index[0], v_edge_index[0]])
    col = jnp.concatenate([u_edge_index[1], v_edge_index[1]])
    wgt = jnp.concatenate([u_edge_weight, v_edge_weight]).astype(jnp.float32)

    # deg[i] = adj_t.sum(axis=1)[i] = sum of A[:, i]   (O(E) segment sum)
    deg = jnp.zeros((N,), jnp.float32).at[col].add(wgt)
    d = jnp.where(deg > 0, jax.lax.rsqrt(deg), 0.0)

    # Pad to tile-friendly shapes; pad rows get d = 0 so they emit zeros.
    # Round N up to the 512-row tile for N > 512 so _pick_tile never degrades
    # to 128-tile streaming on awkward sizes.
    Np = _round_up(N, 512) if N > 512 else _round_up(N, 128)
    Cin_p = _round_up(Cin, 128)
    Cout_p = _round_up(Cout, 128)

    # Densify adj_t = A.T with ONE scatter-add into the padded buffer and a
    # single bf16 cast (no redundant N^2 passes).
    # TODO(synk): cache adj_p across calls for static graphs; for large/sparse
    # graphs replace the dense stream with a scalar-prefetch gather SpMM.
    adj_p = (
        jnp.zeros((Np, Np), jnp.float32).at[col, row].add(wgt)
    ).astype(jnp.bfloat16)

    x_p = jnp.zeros((Np, Cin_p), jnp.bfloat16).at[:N, :Cin].set(
        x.astype(jnp.bfloat16))
    w_p = jnp.zeros((Cin_p, Cout_p), jnp.bfloat16).at[:Cin, :Cout].set(
        w.astype(jnp.bfloat16))
    d_p = jnp.zeros((Np, 1), jnp.float32).at[:N, 0].set(d)

    # --- kernel 1: h = d ⊙ (x @ W), bf16 result for streaming ---
    tm1 = min(512, Np)
    tn1 = _pick_tile(Cout_p, (512, 256, 128))
    tk1 = _pick_tile(Cin_p, (512, 256, 128))
    h = _feat_transform(x_p, w_p, d_p, tm=tm1, tn=tn1, tk=tk1)

    # --- kernel 2: out = ReLU( d ⊙ (adj_t @ h) ), single pass over adj_t ---
    resident_h = (2 * Np * Cout_p * 2) <= 8 * 1024 * 1024
    tm2, tn2, tk2 = _agg_tiles(Np, Cout_p, resident_h)
    out_p = _aggregate(adj_p, h, d_p, tm=tm2, tn=tn2, tk=tk2,
                       resident_h=resident_h)

    return out_p[:N, :Cout]


# --------------------------------------------------------------------------
if __name__ == "__main__":
    key = jax.random.PRNGKey(0)
    size_u, size_v = 48, 80
    N = size_u + size_v                  # 128 nodes
    in_channels, out_channels = 64, 64
    n_u_edges, n_v_edges = 256, 256

    ks = jax.random.split(key, 8)
    x = jax.random.normal(ks[0], (N, in_channels), jnp.float32)
    w = jax.random.normal(ks[1], (in_channels, out_channels), jnp.float32)
    w = w / jnp.sqrt(jnp.float32(in_channels))

    # u-edges: u-nodes -> v-nodes ; v-edges: v-nodes -> u-nodes
    u_row = jax.random.randint(ks[2], (n_u_edges,), 0, size_u)
    u_col = jax.random.randint(ks[3], (n_u_edges,), size_u, N)
    u_edge_index = jnp.stack([u_row, u_col])
    u_edge_weight = jax.random.uniform(ks[4], (n_u_edges,), jnp.float32)

    v_row = jax.random.randint(ks[5], (n_v_edges,), size_u, N)
    v_col = jax.random.randint(ks[6], (n_v_edges,), 0, size_u)
    v_edge_index = jnp.stack([v_row, v_col])
    v_edge_weight = jax.random.uniform(ks[7], (n_v_edges,), jnp.float32)

    out = share_gcn_forward(x, w, u_edge_index, u_edge_weight,
                            v_edge_index, v_edge_weight, N)
    out = jax.block_until_ready(out)

    # Pure-JAX f32 reference with the module's exact math.
    A = jnp.zeros((N, N), jnp.float32).at[
        jnp.concatenate([u_row, v_row]),
        jnp.concatenate([u_col, v_col])].add(
            jnp.concatenate([u_edge_weight, v_edge_weight]))
    adj_t_ref = A.T
    deg_ref = adj_t_ref.sum(axis=1)
    d_ref = jnp.where(deg_ref > 0, 1.0 / jnp.sqrt(deg_ref), 0.0)
    ref = jnp.maximum(
        d_ref[:, None] * (adj_t_ref @ (d_ref[:, None] * (x @ w))), 0.0)

    err = float(np.max(np.abs(np.asarray(out) - np.asarray(ref))))
    assert np.allclose(np.asarray(out), np.asarray(ref),
                       rtol=5e-2, atol=5e-2), f"max abs err {err}"
    print("KERNEL_OK")
</pallas_src>

<mosaic_0001>
module attributes {stable_mosaic.version = 11 : i64} {
  func.func @_feat_kernel(%arg0: i32, %arg1: i32, %arg2: i32, %arg3: memref<128x128xbf16, #tpu.memory_space<vmem>>, %arg4: memref<128x128xbf16, #tpu.memory_space<vmem>>, %arg5: memref<128x1xf32, #tpu.memory_space<vmem>>, %arg6: memref<128x128xbf16, #tpu.memory_space<vmem>>, %arg7: memref<128x128xf32, #tpu.memory_space<vmem>>) attributes {dimension_semantics = [#tpu.dimension_semantics<parallel>, #tpu.dimension_semantics<parallel>, #tpu.dimension_semantics<arbitrary>], iteration_bounds = array<i64: 1, 1, 1>, scalar_prefetch = 0 : i64, scratch_operands = 1 : i64, tpu.core_type = #tpu.core_type<tc>, window_params = [{transform_indices = @transform_0, window_bounds = array<i64: 128, 128>}, {transform_indices = @transform_1, window_bounds = array<i64: 128, 128>}, {transform_indices = @transform_2, window_bounds = array<i64: 128, 1>}, {transform_indices = @transform_3, window_bounds = array<i64: 128, 128>}]} {
    %c0_i32 = arith.constant 0 : i32
    %0 = arith.cmpi eq, %arg2, %c0_i32 : i32
    %1 = arith.extui %0 : i1 to i32
    %c0_i32_0 = arith.constant 0 : i32
    %2 = arith.cmpi ne, %1, %c0_i32_0 : i32
    scf.if %2 {
      %cst_10 = arith.constant 0.000000e+00 : f32
      %12 = vector.broadcast %cst_10 : f32 to vector<128x128xf32>
      %c0_11 = arith.constant 0 : index
      %c0_12 = arith.constant 0 : index
      %13 = vector.load %arg7[%c0_11, %c0_12] : memref<128x128xf32, #tpu.memory_space<vmem>>, vector<128x128xf32>
      tpu.vector_store %arg7[%c0_11, %c0_12], %12 {strides = array<i32>} : memref<128x128xf32, #tpu.memory_space<vmem>>, vector<128x128xf32>,
    } else {
    }
    %c0 = arith.constant 0 : index
    %c0_1 = arith.constant 0 : index
    %3 = vector.load %arg7[%c0, %c0_1] : memref<128x128xf32, #tpu.memory_space<vmem>>, vector<128x128xf32>
    %c0_2 = arith.constant 0 : index
    %c0_3 = arith.constant 0 : index
    %4 = vector.load %arg3[%c0_2, %c0_3] : memref<128x128xbf16, #tpu.memory_space<vmem>>, vector<128x128xbf16>
    %c0_4 = arith.constant 0 : index
    %c0_5 = arith.constant 0 : index
    %5 = vector.load %arg4[%c0_4, %c0_5] : memref<128x128xbf16, #tpu.memory_space<vmem>>, vector<128x128xbf16>
    %cst = arith.constant dense<0.000000e+00> : vector<128x128xf32>
    %6 = tpu.matmul %4, %5, %cst {dimension_numbers = #tpu.dot_dimension_numbers<[1], [0], [0], [1], [0, 0, 1, 1], [], []>} : vector<128x128xbf16>, vector<128x128xbf16>, vector<128x128xf32> -> vector<128x128xf32>
    %7 = arith.addf %3, %6 : vector<128x128xf32>
    %c0_6 = arith.constant 0 : index
    %c0_7 = arith.constant 0 : index
    %8 = vector.load %arg7[%c0_6, %c0_7] : memref<128x128xf32, #tpu.memory_space<vmem>>, vector<128x128xf32>
    tpu.vector_store %arg7[%c0_6, %c0_7], %7 {strides = array<i32>} : memref<128x128xf32, #tpu.memory_space<vmem>>, vector<128x128xf32>,
    %c0_i32_8 = arith.constant 0 : i32
    %9 = arith.cmpi eq, %arg2, %c0_i32_8 : i32
    %10 = arith.extui %9 : i1 to i32
    %c0_i32_9 = arith.constant 0 : i32
    %11 = arith.cmpi ne, %10, %c0_i32_9 : i32
    scf.if %11 {
      %c0_10 = arith.constant 0 : index
      %c0_11 = arith.constant 0 : index
      %12 = vector.load %arg5[%c0_10, %c0_11] : memref<128x1xf32, #tpu.memory_space<vmem>>, vector<128x1xf32>
      %c0_12 = arith.constant 0 : index
      %c0_13 = arith.constant 0 : index
      %13 = vector.load %arg7[%c0_12, %c0_13] : memref<128x128xf32, #tpu.memory_space<vmem>>, vector<128x128xf32>
      %14 = vector.broadcast %12 : vector<128x1xf32> to vector<128x128xf32>
      %15 = arith.mulf %14, %13 : vector<128x128xf32>
      %16 = arith.truncf %15 : vector<128x128xf32> to vector<128x128xbf16>
      %c0_14 = arith.constant 0 : index
      %c0_15 = arith.constant 0 : index
      %17 = vector.load %arg6[%c0_14, %c0_15] : memref<128x128xbf16, #tpu.memory_space<vmem>>, vector<128x128xbf16>
      tpu.vector_store %arg6[%c0_14, %c0_15], %16 {strides = array<i32>} : memref<128x128xbf16, #tpu.memory_space<vmem>>, vector<128x128xbf16>,
    } else {
    }
    return
  }
  func.func @transform_0(%arg0: i32, %arg1: i32, %arg2: i32) -> (i32, i32) {
    %c0_i32 = arith.constant 0 : i32
    return %arg0, %arg2 : i32, i32
  }
  func.func @transform_1(%arg0: i32, %arg1: i32, %arg2: i32) -> (i32, i32) {
    %c0_i32 = arith.constant 0 : i32
    return %arg2, %arg1 : i32, i32
  }
  func.func @transform_2(%arg0: i32, %arg1: i32, %arg2: i32) -> (i32, i32) {
    %c0_i32 = arith.constant 0 : i32
    %c0_i32_0 = arith.constant 0 : i32
    return %arg0, %c0_i32 : i32, i32
  }
  func.func @transform_3(%arg0: i32, %arg1: i32, %arg2: i32) -> (i32, i32) {
    %c0_i32 = arith.constant 0 : i32
    return %arg0, %arg1 : i32, i32
  }
}

</mosaic_0001>

<bundles_post_ra>
// kernel: tpu_custom_call.1
= control target key start
LH: loop header
LB: loop body
LE: loop exit
PB: predicated region body
PF: predicated region fallthrough
CT: control target
= control target key end

     0   :  { %v741_v2 = vmov 0   ;;  %s873_s0 = inlined_call_operand.vmem [shape: bf16[128,128], index: 0, kind: input, shape index: {}]   ;;  %s874_s1 = inlined_call_operand.vmem [shape: bf16[128,128], index: 1, kind: input, shape index: {}]   ;;  %s875_s2 = inlined_call_operand.vmem [shape: f32[128,1], index: 2, kind: input, shape index: {}]   ;;  %s876_s3 = inlined_call_operand.hbm [shape: bf16[128,128], index: 3, kind: output, shape index: {}]  }
   0x1   :  { %v701_v0 = vld [vmem:[%s874_s1] sm:$0xff]   ;;  %v702_v1 = vld [vmem:[%s874_s1 + $0x8] sm:$0xff]   ;;  %700 = vset.pattern.permute.xlu1 %v741_v2  ;;  %699 = vset.pattern.permute.xlu0 %v741_v2  ;;  %v703_v3 = vld [vmem:[%s874_s1 + $0x10] sm:$0xff]  }
   0x2   :  { %647 = vmatprep.subr.bf16.mxu0 %v701_v0  ;;  %679 = vmatprep.subr.bf16.mxu1 %v701_v0  ;;  %v704_v4 = vld [vmem:[%s874_s1 + $0x18] sm:$0xff]   ;;  %v709_v5 = vld [vmem:[%s873_s0] sm:$0xff]   ;;  %v706_v8 = vld [vmem:[%s874_s1 + $0x28] sm:$0xff]  }
   0x3   :  { %648 = vmatpush3.bf16.msra.mxu0 %v701_v0  ;;  %687 = vmatpush3.bf16.msra.mxu1 %v701_v0  ;;  %v710_v6 = vld [vmem:[%s873_s0 + $0x20] sm:$0xff]   ;;  %v314_v9 = vld [vmem:[%s875_s2 + $0x10] sm:$0xff]  ;;  %v315_v11 = vld [vmem:[%s875_s2 + $0x18] sm:$0xff] }
   0x4   :  { %649 = vmatprep.subr.bf16.mxu0 %v702_v1  ;;  %680 = vmatprep.subr.bf16.mxu1 %v702_v1  ;;  %v705_v7 = vld [vmem:[%s874_s1 + $0x20] sm:$0xff]   ;;  %v313_v12 = vld [vmem:[%s875_s2 + $0x8] sm:$0xff]  ;;  %v707_v13 = vld [vmem:[%s874_s1 + $0x30] sm:$0xff]  }
   0x5   :  { %663 = vmatprep.mubr.bf16.mxu0 %v709_v5  ;;  %671 = vmatprep.mubr.bf16.mxu1 %v710_v6  ;;  %v312_v10 = vld [vmem:[%s875_s2] sm:$0xff] }
   0x6   :  { %356 = vperm.xlu1 %700, %v314_v9   ;;  %346 = vperm.xlu0 %699, %v312_v10  }
   0x7   :  { %650 = vmatpush3.bf16.msra.mxu0 %v702_v1  ;;  %688 = vmatpush3.bf16.msra.mxu1 %v702_v1 }
   0x8   :  { %651 = vmatprep.subr.bf16.mxu0 %v703_v3  ;;  %681 = vmatprep.subr.bf16.mxu1 %v703_v3 }
   0xa   :  { %361 = vperm.xlu1 %700, %v315_v11   ;;  %351 = vperm.xlu0 %699, %v313_v12  }
   0xb   :  { %652 = vmatpush3.bf16.msra.mxu0 %v703_v3  ;;  %689 = vmatpush3.bf16.msra.mxu1 %v703_v3 }
   0xc   :  { %653 = vmatprep.subr.bf16.mxu0 %v704_v4  ;;  %682 = vmatprep.subr.bf16.mxu1 %v704_v4 }
   0xf   :  { %654 = vmatpush3.bf16.msra.mxu0 %v704_v4  ;;  %690 = vmatpush3.bf16.msra.mxu1 %v704_v4 }
  0x10   :  { %655 = vmatprep.subr.bf16.mxu0 %v705_v7  ;;  %683 = vmatprep.subr.bf16.mxu1 %v705_v7 }
  0x13   :  { %656 = vmatpush3.bf16.msra.mxu0 %v705_v7  ;;  %691 = vmatpush3.bf16.msra.mxu1 %v705_v7 }
  0x14   :  { %657 = vmatprep.subr.bf16.mxu0 %v706_v8  ;;  %684 = vmatprep.subr.bf16.mxu1 %v706_v8 }
  0x15   :  { %8 = vsyncpa [#allocation4], 0  ;;  %v317_v14 = vld [vmem:[%s875_s2 + $0x28] sm:$0xff]  ;;  %v316_v15 = vld [vmem:[%s875_s2 + $0x20] sm:$0xff] }
  0x16   :  { %v708_v16 = vld [vmem:[%s874_s1 + $0x38] sm:$0xff]   ;;  %371 = vperm.xlu1 %700, %v317_v14   ;;  %366 = vperm.xlu0 %699, %v316_v15   ;;  %v318_v18 = vld [vmem:[%s875_s2 + $0x30] sm:$0xff]  ;;  %v711_v19 = vld [vmem:[%s873_s0 + $0x8] sm:$0xff]  }
  0x17   :  { %658 = vmatpush3.bf16.msra.mxu0 %v706_v8  ;;  %692 = vmatpush3.bf16.msra.mxu1 %v706_v8  ;;  %v319_v17 = vld [vmem:[%s875_s2 + $0x38] sm:$0xff]  ;;  %v712_v20 = vld [vmem:[%s873_s0 + $0x28] sm:$0xff]   ;;  %v320_v22 = vld [vmem:[%s875_s2 + $0x40] sm:$0xff] }
  0x18   :  { %659 = vmatprep.subr.bf16.mxu0 %v707_v13  ;;  %685 = vmatprep.subr.bf16.mxu1 %v707_v13  ;;  %v321_v21 = vld [vmem:[%s875_s2 + $0x48] sm:$0xff]  ;;  %v713_v23 = vld [vmem:[%s873_s0 + $0x10] sm:$0xff]   ;;  %v323_v25 = vld [vmem:[%s875_s2 + $0x58] sm:$0xff] }
  0x19   :  { %v714_v24 = vld [vmem:[%s873_s0 + $0x30] sm:$0xff]   ;;  %v715_v27 = vld [vmem:[%s873_s0 + $0x18] sm:$0xff]   ;;  %v325_v29 = vld [vmem:[%s875_s2 + $0x68] sm:$0xff] }
  0x1a   :  { %381 = vperm.xlu1 %700, %v319_v17   ;;  %376 = vperm.xlu0 %699, %v318_v18   ;;  %v322_v26 = vld [vmem:[%s875_s2 + $0x50] sm:$0xff]  ;;  %v716_v28 = vld [vmem:[%s873_s0 + $0x38] sm:$0xff]   ;;  %v324_v30 = vld [vmem:[%s875_s2 + $0x60] sm:$0xff]  ;;  %s742_s0 = smov [#allocation3]  }
  0x1b   :  { %660 = vmatpush3.bf16.msra.mxu0 %v707_v13  ;;  %693 = vmatpush3.bf16.msra.mxu1 %v707_v13  ;;  %v327_v31 = vld [vmem:[%s875_s2 + $0x78] sm:$0xff]  ;;  %v326_v32 = vld [vmem:[%s875_s2 + $0x70] sm:$0xff]  ;;  %s525_s2 = sshll.u32 %s742_s0, 4  ;;  %s526_s2 = int_to_ptr.vmem [resolvable:$true] %s525_s2 }
  0x1c   :  { %661 = vmatprep.subr.bf16.mxu0 %v708_v16  ;;  %686 = vmatprep.subr.bf16.mxu1 %v708_v16  ;;  %s717_s21 = scalar_lea.vmem %s526_s2, 1024  ;;  %p722_p1 = scmp.lt.s32.totalorder %s526_s2, %s526_s2 }
  0x1d   :  { %p718_p0 = scmp.ne.s32.totalorder %s526_s2, %s717_s21  ;;  %p723_p2 = scmp.lt.s32.totalorder %s717_s21, %s717_s21 }
  0x1e   :  { %391 = vperm.xlu1 %700, %v321_v21   ;;  %386 = vperm.xlu0 %699, %v320_v22  }
  0x1f   :  { %662 = vmatpush3.bf16.msra.mxu0 %v708_v16  ;;  %694 = vmatpush3.bf16.msra.mxu1 %v708_v16  ;;  %p724_p3 = por %p723_p2, %p722_p1 }
  0x21   :  { %p725_p4 = pnand %p724_p3, %p718_p0 }
  0x22   :  { %664 = vmatmul.mubr.bf16.vlgmr.msra.gmra.mrb[0].mxu0 %v711_v19  ;;  %672 = vmatmul.mubr.bf16.vlgmr.msra.gmra.mrb[0].mxu1 %v712_v20 }
  0x23   :  { %667 = vmatprep.mubr.bf16.mxu0 %v713_v23  ;;  %675 = vmatprep.mubr.bf16.mxu1 %v714_v24 }
  0x24   :  { %401 = vperm.xlu1 %700, %v323_v25   ;;  %396 = vperm.xlu0 %699, %v322_v26  }
  0x28   :  { %411 = vperm.xlu1 %700, %v325_v29   ;;  %406 = vperm.xlu0 %699, %v324_v30  }
  0x2a   :  { %668 = vmatmul.mubr.bf16.gmra.mrb[4].mxu0 %v715_v27  ;;  %676 = vmatmul.mubr.bf16.gmra.mrb[4].mxu1 %v716_v28 }
  0x2c   :  { %421 = vperm.xlu1 %700, %v327_v31   ;;  %416 = vperm.xlu0 %699, %v326_v32  }
  0x85   :  { %v357_v33 = vpop.permute.xlu1 %356  ;;  %v347_v34 = vpop.permute.xlu0 %346 }
  0x89   :  { %v362_v35 = vpop.permute.xlu1 %361  ;;  %v352_v36 = vpop.permute.xlu0 %351 }
  0x95   :  { %v372_v37 = vpop.permute.xlu1 %371  ;;  %v367_v38 = vpop.permute.xlu0 %366 }
  0x99   :  { %v382_v39 = vpop.permute.xlu1 %381  ;;  %v377_v40 = vpop.permute.xlu0 %376 }
  0x9d   :  { %v392_v41 = vpop.permute.xlu1 %391  ;;  %v387_v42 = vpop.permute.xlu0 %386 }
  0xa3   :  { %v402_v43 = vpop.permute.xlu1 %401  ;;  %v397_v44 = vpop.permute.xlu0 %396 }
  0xa7   :  { %v412_v45 = vpop.permute.xlu1 %411  ;;  %v407_v46 = vpop.permute.xlu0 %406 }
  0xab   :  { %v422_v3 = vpop.permute.xlu1 %421  ;;  %v417_v4 = vpop.permute.xlu0 %416 }
  0xf5   :  { %v665_v47 = vpop.f32.mrb[0].mxu0  ;;  %v673_v48 = vpop.f32.mrb[0].mxu1 }
  0xf6   :  { %v214_v49 = vpop.f32.mrb[1].mxu0  ;;  %v246_v50 = vpop.f32.mrb[1].mxu1  ;;  %v426_v53 = vmul.f32 %v665_v47, %v357_v33  ;;  %v434_v54 = vmul.f32 %v673_v48, %v397_v44 }
  0xf7   :  { %v666_v51 = vpop.f32.mrb[2].mxu0  ;;  %v674_v52 = vpop.f32.mrb[2].mxu1  ;;  %v424_v59 = vmul.f32 %v347_v34, %v214_v49  ;;  %v432_v60 = vmul.f32 %v387_v42, %v246_v50 }
  0xf8   :  { %v427_v55 = vmul.f32 %v666_v51, %v362_v35  ;;  %v435_v56 = vmul.f32 %v674_v52, %v402_v43  ;;  %v217_v57 = vpop.f32.mrb[3].mxu0  ;;  %v249_v58 = vpop.f32.mrb[3].mxu1 }
  0xf9   :  { %v425_v61 = vmul.f32 %v352_v36, %v217_v57  ;;  %v433_v62 = vmul.f32 %v392_v41, %v249_v58 }
  0xfa   :  { %v592_v63 = vpack.c.bf16 %v427_v55, %v426_v53  ;;  %v612_v0 = vpack.c.bf16 %v435_v56, %v434_v54 }
  0xfb   :  { %v587_v1 = vpack.c.bf16 %v425_v61, %v424_v59  ;;  %v607_v2 = vpack.c.bf16 %v433_v62, %v432_v60 }
  0xfc   :  { %624 = vst [vmem:[#allocation3 + $0x8] sm:$0xff] %v592_v63   ;;  %628 = vst [vmem:[#allocation3 + $0x28] sm:$0xff] %v612_v0  }
  0xfd   :  { %588 = vst [vmem:[#allocation3] sm:$0xff] %v587_v1   ;;  %627 = vst [vmem:[#allocation3 + $0x20] sm:$0xff] %v607_v2   ;;  %v669_v5 = vpop.f32.mrb[4].mxu0  ;;  %v677_v6 = vpop.f32.mrb[4].mxu1 }
  0xfe   :  { %v230_v7 = vpop.f32.mrb[5].mxu0  ;;  %v262_v8 = vpop.f32.mrb[5].mxu1  ;;  %v430_v11 = vmul.f32 %v669_v5, %v377_v40  ;;  %v438_v12 = vmul.f32 %v677_v6, %v417_v4 }
  0xff   :  { %v670_v9 = vpop.f32.mrb[6].mxu0  ;;  %v678_v10 = vpop.f32.mrb[6].mxu1  ;;  %v428_v17 = vmul.f32 %v367_v38, %v230_v7  ;;  %v436_v18 = vmul.f32 %v407_v46, %v262_v8 }
 0x100   :  { %v431_v13 = vmul.f32 %v670_v9, %v382_v39  ;;  %v439_v14 = vmul.f32 %v678_v10, %v422_v3  ;;  %v233_v15 = vpop.f32.mrb[7].mxu0  ;;  %v265_v16 = vpop.f32.mrb[7].mxu1 }
 0x101   :  { %v429_v19 = vmul.f32 %v372_v37, %v233_v15  ;;  %v437_v20 = vmul.f32 %v412_v45, %v265_v16 }
 0x102   :  { %v602_v21 = vpack.c.bf16 %v431_v13, %v430_v11  ;;  %v622_v22 = vpack.c.bf16 %v439_v14, %v438_v12 }
 0x103   :  { %v597_v23 = vpack.c.bf16 %v429_v19, %v428_v17  ;;  %v617_v24 = vpack.c.bf16 %v437_v20, %v436_v18 }
 0x104   :  { %626 = vst [vmem:[#allocation3 + $0x18] sm:$0xff] %v602_v21   ;;  %630 = vst [vmem:[#allocation3 + $0x38] sm:$0xff] %v622_v22  }
 0x105   :  { %625 = vst [vmem:[#allocation3 + $0x10] sm:$0xff] %v597_v23   ;;  %629 = vst [vmem:[#allocation3 + $0x30] sm:$0xff] %v617_v24  }
 0x106   :  { %728 = shalt.err (!%p725_p4)
}
 0x107   :  { %s729_s23 = scalar_lea.hbm %s876_s3, 1024 }
 0x108   :  { %p730_p5 = scmp.ne.s32.totalorder %s876_s3, %s729_s23  ;;  %p733_p6 = scmp.lt.u32.totalorder %s729_s23, %s876_s3 }
 0x10a   :  { %p735_p7 = pnand %p733_p6, %p730_p5 }
 0x10c   :  { %738 = shalt.err (!%p735_p7)
}
 0x10d   :  { %s743_s28 = smov 64   ;;  %s744_s29 = smov 4  }
 0x10e   :  { %531 = dma.vmem_to_hbm [thread:$0]  %s526_s2, 1024, %s876_s3, [#allocation4], %s743_s28, %s743_s28, %s744_s29  }
 0x10f   :  { %739 = dma.done.wait [#allocation4], 1024  }
 0x110   :  { %740 = vsyncadd [#allocation4], 4294966272 }
 0x111   :  { %535 = vsyncpa [#allocation4], 1 }

</bundles_post_ra>
